<compile_context>
chip_gen: v7x
topology: tpu7x:2x2x1
jax: 0.10.0
libtpu: 0.0.40
codegen_flags: <defaults>
</compile_context>

<pallas_src>
import math

import jax
import jax.numpy as jnp
from jax.experimental import pallas as pl
from jax.experimental.pallas import tpu as pltpu  # noqa: F401  (TPU backend)


def _select_design_kernel(design_ref, out_ref):
    # Row selection already happened via the index_map DMA; the body is a
    # straight full-tile VMEM copy of the chosen design.
    out_ref[...] = design_ref[...]


def batch_design_baseline_forward(designs_stacked: jax.Array, num_pairs: int) -> jax.Array:
    """Pallas equivalent of BatchDesignBaseline.forward(*design_obs_pairs).

    designs_stacked: (T, *design_dim) stacked design parameters.
    num_pairs:       static Python int == len(design_obs_pairs) == index j.
    Returns designs_stacked[num_pairs] with shape design_dim.
    """
    T = designs_stacked.shape[0]
    design_dim = designs_stacked.shape[1:]
    if not 0 <= num_pairs < T:
        # Matches PyTorch: self.designs[j] would raise IndexError.
        raise IndexError(f"design index {num_pairs} out of range for T={T}")

    nd = len(design_dim)
    d_flat = math.prod(design_dim)
    itemsize = jnp.dtype(designs_stacked.dtype).itemsize

    # Input block: squeeze the T axis, take the full design tile. The last
    # two block dims equal the full array dims, so no (8,128) padding needed.
    in_spec = pl.BlockSpec(
        (pl.Squeezed(),) + design_dim,
        lambda i: (num_pairs,) + (0,) * nd,   # static j baked into the DMA
    )
    out_spec = pl.BlockSpec(design_dim, lambda i: (0,) * nd)

    out = pl.pallas_call(
        _select_design_kernel,
        out_shape=jax.ShapeDtypeStruct(design_dim, designs_stacked.dtype),
        grid=(1,),
        in_specs=[in_spec],
        out_specs=out_spec,
        cost_estimate=pl.CostEstimate(
            flops=0,
            transcendentals=0,
            bytes_accessed=2 * d_flat * itemsize,  # one row read + one write
        ),
    )(designs_stacked)
    return out


if __name__ == "__main__":
    # Module hyperparameters (small, consistent with __init__):
    T = 4                  # number of experiment steps / designs
    design_dim = (8, 16)   # design tensor shape; block == full dims -> no padding

    # Deterministic init. (PyTorch inits designs to zeros; use a deterministic
    # random init here so the row selection is observable.)
    key = jax.random.PRNGKey(0)
    designs_stacked = jax.random.normal(key, (T,) + design_dim, dtype=jnp.float32)

    # Dummy design/obs pairs; forward only uses their count.
    k1, k2 = jax.random.split(key)
    design_obs_pairs = [
        (jax.random.normal(k1, design_dim), jax.random.normal(k2, (1,))),
        (jax.random.normal(k2, design_dim), jax.random.normal(k1, (1,))),
    ]
    j = len(design_obs_pairs)  # forward returns designs[j]

    result = batch_design_baseline_forward(designs_stacked, j)
    result = jax.block_until_ready(result)

    expected = designs_stacked[j]
    assert result.shape == design_dim
    assert jnp.allclose(result, expected), "kernel output != designs[j]"

    print("KERNEL_OK")
</pallas_src>

<mosaic_0001>
module attributes {stable_mosaic.version = 11 : i64} {
  func.func @_select_design_kernel(%arg0: i32, %arg1: memref<1x8x16xf32, #tpu.memory_space<vmem>>, %arg2: memref<8x16xf32, #tpu.memory_space<vmem>>) attributes {dimension_semantics = [#tpu.dimension_semantics<arbitrary>], iteration_bounds = array<i64: 1>, scalar_prefetch = 0 : i64, scratch_operands = 0 : i64, tpu.core_type = #tpu.core_type<tc>, window_params = [{transform_indices = @transform_0, window_bounds = array<i64: 1, 8, 16>}, {pipeline_mode = #tpu.pipeline_mode<synchronous>, transform_indices = @transform_1, window_bounds = array<i64: 8, 16>}]} {
    %c0 = arith.constant 0 : index
    %c0_0 = arith.constant 0 : index
    %c0_1 = arith.constant 0 : index
    %0 = vector.load %arg1[%c0, %c0_0, %c0_1] : memref<1x8x16xf32, #tpu.memory_space<vmem>>, vector<1x8x16xf32>
    %1 = vector.shape_cast %0 : vector<1x8x16xf32> to vector<8x16xf32>
    %c0_2 = arith.constant 0 : index
    %c0_3 = arith.constant 0 : index
    %2 = vector.load %arg2[%c0_2, %c0_3] : memref<8x16xf32, #tpu.memory_space<vmem>>, vector<8x16xf32>
    tpu.vector_store %arg2[%c0_2, %c0_3], %1 {strides = array<i32>} : memref<8x16xf32, #tpu.memory_space<vmem>>, vector<8x16xf32>,
    return
  }
  func.func @transform_0(%arg0: i32) -> (i32, i32, i32) {
    %c2_i32 = arith.constant 2 : i32
    %c0_i32 = arith.constant 0 : i32
    %c0_i32_0 = arith.constant 0 : i32
    %c0_i32_1 = arith.constant 0 : i32
    return %c2_i32, %c0_i32, %c0_i32_0 : i32, i32, i32
  }
  func.func @transform_1(%arg0: i32) -> (i32, i32) {
    %c0_i32 = arith.constant 0 : i32
    %c0_i32_0 = arith.constant 0 : i32
    %c0_i32_1 = arith.constant 0 : i32
    return %c0_i32, %c0_i32_0 : i32, i32
  }
}

</mosaic_0001>

<bundles_post_ra>
// kernel: tpu_custom_call.1
= control target key start
LH: loop header
LB: loop body
LE: loop exit
PB: predicated region body
PF: predicated region fallthrough
CT: control target
= control target key end

     0   :  { %6 = vsyncpa [#allocation3], 0  ;;  %s129_s0 = inlined_call_operand.hbm [shape: f32[4,8,16], index: 0, kind: input, shape index: {}]   ;;  %s130_s1 = inlined_call_operand.hbm [shape: f32[8,16], index: 1, kind: output, shape index: {}]  }
   0x1   :  { %7 = vsyncpa [#allocation4], 0  ;;  %s13_s8 = scalar_lea.hbm %s129_s0, 256  ;;  %s93_s9 = smov [#allocation2]  }
   0x2   :  { %s15_s10 = sshll.u32 %s93_s9, 4  ;;  %s66_s13 = scalar_lea.hbm %s129_s0, 384  ;;  %s16_s10 = int_to_ptr.vmem [resolvable:$true] %s15_s10 }
   0x3   :  { %p43_p0 = scmp.ne.s32.totalorder %s13_s8, %s66_s13  ;;  %s44_s16 = scalar_lea.hbm %s129_s0, 512 }
   0x4   :  { %p45_p1 = scmp.lt.u32.totalorder %s13_s8, %s129_s0  ;;  %p46_p2 = scmp.lt.u32.totalorder %s44_s16, %s66_s13 }
   0x5   :  { %p48_p4 = scmp.lt.u32.totalorder %s66_s13, %s13_s8 }
   0x6   :  { %p47_p3 = por %p46_p2, %p45_p1 }
   0x8   :  { %p49_p5 = por %p48_p4, %p47_p3 }
   0xa   :  { %p50_p6 = pnand %p49_p5, %p43_p0 }
   0xc   :  { %53 = shalt.err (!%p50_p6)
}
   0xd   :  { %s54_s19 = scalar_lea.vmem %s16_s10, 128  ;;  %p59_p8 = scmp.lt.s32.totalorder %s16_s10, %s16_s10 }
   0xe   :  { %p55_p7 = scmp.ne.s32.totalorder %s16_s10, %s54_s19  ;;  %p60_p9 = scmp.lt.s32.totalorder %s54_s19, %s54_s19 }
  0x10   :  { %p61_p10 = por %p60_p9, %p59_p8 }
  0x12   :  { %p62_p11 = pnand %p61_p10, %p55_p7 }
  0x14   :  { %65 = shalt.err (!%p62_p11)
}
  0x15   :  { %18 = dma.hbm_to_vmem [thread:$0]  %s13_s8, 128, %s16_s10, [#allocation3]  }
  0x16   :  { %89 = dma.done.wait [#allocation3], 128  }
  0x17   :  { %90 = vsyncadd [#allocation3], 4294967168  ;;  %s94_s20 = smov [#allocation5]   ;;  %vm23_vm0 = vcmask 130048   ;;  %v22_v0 = vld [vmem:[#allocation2] sm:$0xff] }
  0x18   :  { %s31_s21 = sshll.u32 %s94_s20, 4  ;;  %24 = vst.msk [vmem:[#allocation5] sm:$0xff] %vm23_vm0, %v22_v0  ;;  %s32_s21 = int_to_ptr.vmem [resolvable:$true] %s31_s21 }
  0x19   :  { %s67_s0 = scalar_lea.vmem %s32_s21, 128  ;;  %p72_p13 = scmp.lt.s32.totalorder %s32_s21, %s32_s21 }
  0x1a   :  { %p68_p12 = scmp.ne.s32.totalorder %s32_s21, %s67_s0  ;;  %p73_p0 = scmp.lt.s32.totalorder %s67_s0, %s67_s0 }
  0x1c   :  { %p74_p1 = por %p73_p0, %p72_p13 }
  0x1e   :  { %p75_p2 = pnand %p74_p1, %p68_p12 }
  0x20   :  { %78 = shalt.err (!%p75_p2)
}
  0x21   :  { %s79_s24 = scalar_lea.hbm %s130_s1, 128 }
  0x22   :  { %p80_p3 = scmp.ne.s32.totalorder %s130_s1, %s79_s24  ;;  %p83_p4 = scmp.lt.u32.totalorder %s79_s24, %s130_s1 }
  0x24   :  { %p85_p5 = pnand %p83_p4, %p80_p3 }
  0x26   :  { %88 = shalt.err (!%p85_p5)
}
  0x27   :  { %34 = dma.vmem_to_hbm [thread:$0]  %s32_s21, 128, %s130_s1, [#allocation4]  }
  0x28   :  { %91 = dma.done.wait [#allocation4], 128  }
  0x29   :  { %92 = vsyncadd [#allocation4], 4294967168 }
  0x2a   :  { %38 = vsyncpa [#allocation3], 1 }
  0x2b   :  { %39 = vsyncpa [#allocation4], 1 }

</bundles_post_ra>
